<compile_context>
chip_gen: v7x
topology: tpu7x:2x2x1
jax: 0.10.0
libtpu: 0.0.40
codegen_flags: <defaults>
</compile_context>

<pallas_src>
import math
import functools

import jax
import jax.numpy as jnp
from jax import lax
from jax.experimental import pallas as pl
from jax.experimental.pallas import tpu as pltpu


def _round_up(x, m):
    return ((x + m - 1) // m) * m


def _topk_sigmoid_mean(scores_t, k_top):
    """scores_t: (K, C) raw (already scaled) scores.  Returns (1, C) mean of
    sigmoid over the k_top largest scores per column (sigmoid is monotone, so
    selecting on raw scores equals selecting on sigmoid(scores))."""
    kp, cols = scores_t.shape
    neg_inf = jnp.float32(-jnp.inf)

    def run(work):
        def step(carry):
            w, acc = carry
            cur = jnp.max(w, axis=0, keepdims=True)          # sublane reduce (VPU-heavy)
            acc = acc + jax.nn.sigmoid(cur)                  # EUP only on selected maxima
            # Knock out selected maxima (exact float ties are measure-zero).
            w = jnp.where(w >= cur, neg_inf, w)
            return w, acc

        acc0 = jnp.zeros((1, work.shape[1]), jnp.float32)
        if k_top <= 16:
            carry = (work, acc0)
            for _ in range(k_top):                           # static unroll: LLO visibility
                carry = step(carry)
            return carry[1]
        return lax.fori_loop(0, k_top, lambda _, c: step(c), (work, acc0),
                             unroll=4)[1]

    if k_top > 16 and cols > 128 and cols % 128 == 0:
        # Large nums: keep the (K, 128) knockout slab local per column chunk
        # instead of streaming the full (K, TM) work array k_top times.
        parts = [run(scores_t[:, c:c + 128]) for c in range(0, cols, 128)]
        acc = jnp.concatenate(parts, axis=1)
    else:
        acc = run(scores_t)
    return acc * jnp.float32(1.0 / k_top)


def _memory_unit_kernel(x_ref, mem_ref, temp_ref, aug_ref, *, dim, k_top, mm_dtype):
    # x_ref:   (TM, D)  feature tile (float32)
    # mem_ref: (K, D)   memory block, already in mm_dtype (cast hoisted to wrapper)
    # temp_ref:(1, TM)  lane-dense temporal attention tile
    # aug_ref: (TM, D)  augment tile
    x = x_ref[...]
    memm = mem_ref[...]

    inv_sqrt_d = jnp.float32(1.0 / math.sqrt(dim))
    xs = (x * inv_sqrt_d).astype(mm_dtype)        # fold 1/sqrt(dim) into x once per tile

    # ---- attention / augment path (MXU + EUP) -------------------------------
    # scores = einsum('md,kd->mk', x, mem) / sqrt(dim)
    scores = lax.dot_general(xs, memm, (((1,), (1,)), ((), ())),
                             preferred_element_type=jnp.float32)      # (TM, K)
    att = jax.nn.sigmoid(scores)                                       # (TM, K)
    aug_ref[...] = jnp.dot(att.astype(mm_dtype), memm,
                           preferred_element_type=jnp.float32).astype(aug_ref.dtype)

    # ---- top-k path on transposed raw scores (sublane reductions) ----------
    if dim >= 512:
        # Large D: reuse the f32 scores via an XLU transpose (skip a 3rd MXU pass).
        scores_t = scores.T                                            # (K, TM)
    else:
        # Small D: the duplicate matmul is cheap and avoids the transpose.
        scores_t = lax.dot_general(memm, xs, (((1,), (1,)), ((), ())),
                                   preferred_element_type=jnp.float32)  # (K, TM)

    temp_ref[...] = _topk_sigmoid_mean(scores_t, k_top)               # (1, TM)


def memory_unit_forward(data, memory_block, *, tile_m=1024,
                        matmul_dtype=jnp.bfloat16, augment_dtype=None,
                        vmem_limit_bytes=32 * 1024 * 1024):
    """data: (B, T, D), memory_block: (K, D).

    Returns (temporal_att (B, T), augment (B, T, D)) like Memory_Unit.forward.
    augment_dtype=jnp.bfloat16 halves the dominant store traffic if downstream
    tolerates it (default: same dtype as `data`).
    """
    B, T, D = data.shape
    K, D2 = memory_block.shape
    assert D == D2
    k_top = K // 16 + 1
    M = B * T
    out_dtype = data.dtype if augment_dtype is None else augment_dtype

    # Row tile: full-extent single block for small M; otherwise a 128-multiple
    # capped so the grid has >= 2 steps (both v7x TensorCores get work).
    if M <= 128:
        tm = M
    else:
        tm = max(128, min(_round_up(tile_m, 128), _round_up(pl.cdiv(M, 2), 128)))
    grid = pl.cdiv(M, tm)

    x = data.reshape(M, D)                       # free reshape (no pad, no copy pass)
    mem_mm = memory_block.astype(matmul_dtype)   # one-time tiny cast, hoisted out of kernel

    # Constant (grid-invariant) memory block: single-buffer it where supported.
    try:
        mem_spec = pl.BlockSpec((K, D), lambda i: (0, 0),
                                pipeline_mode=pl.Buffered(1))
    except (TypeError, AttributeError):
        mem_spec = pl.BlockSpec((K, D), lambda i: (0, 0))

    kernel = functools.partial(_memory_unit_kernel, dim=D, k_top=k_top,
                               mm_dtype=matmul_dtype)

    temp, aug = pl.pallas_call(
        kernel,
        out_shape=(
            jax.ShapeDtypeStruct((1, M), jnp.float32),   # lane-dense temporal slab
            jax.ShapeDtypeStruct((M, D), out_dtype),     # augment
        ),
        grid_spec=pltpu.PrefetchScalarGridSpec(
            num_scalar_prefetch=0,
            grid=(grid,),
            in_specs=[
                pl.BlockSpec((tm, D), lambda i: (i, 0)),   # x tile
                mem_spec,                                  # memory block, resident
            ],
            out_specs=[
                pl.BlockSpec((1, tm), lambda i: (0, i)),   # temporal tile
                pl.BlockSpec((tm, D), lambda i: (i, 0)),   # augment tile
            ],
        ),
        compiler_params=pltpu.CompilerParams(
            dimension_semantics=("parallel",),             # rows independent -> megacore
            vmem_limit_bytes=vmem_limit_bytes,
        ),
    )(x, mem_mm)

    temporal_att = temp[0].reshape(B, T)     # free views — no extra HBM slice pass
    augment = aug.reshape(B, T, D)
    return temporal_att, augment


def _reference(data, memory_block):
    # Pure-JAX float32 reference of the PyTorch forward.
    K, D = memory_block.shape
    k_top = K // 16 + 1
    att = jax.nn.sigmoid(
        jnp.einsum('btd,kd->btk', data, memory_block) / math.sqrt(D))
    topk = lax.top_k(att, k_top)[0]
    temporal_att = topk.mean(-1)
    augment = jnp.einsum('btk,kd->btd', att, memory_block)
    return temporal_att, augment


if __name__ == "__main__":
    # Module hyper-params (small, consistent with Memory_Unit(nums, dim)).
    nums, dim = 64, 32
    B, T = 2, 8

    key = jax.random.PRNGKey(0)
    k_mem, k_data = jax.random.split(key)

    # reset_parameters: uniform(-stdv, stdv), stdv = 1/sqrt(dim)
    stdv = 1.0 / math.sqrt(dim)
    memory_block = jax.random.uniform(
        k_mem, (nums, dim), dtype=jnp.float32, minval=-stdv, maxval=stdv)
    data = jax.random.normal(k_data, (B, T, dim), dtype=jnp.float32)

    fwd = jax.jit(memory_unit_forward)
    temporal_att, augment = fwd(data, memory_block)
    jax.block_until_ready((temporal_att, augment))

    assert temporal_att.shape == (B, T)
    assert augment.shape == (B, T, dim)

    # Loose-tolerance check vs float32 reference (bf16 MXU inputs in the kernel).
    ref_t, ref_a = _reference(data, memory_block)
    assert jnp.allclose(temporal_att, ref_t, atol=5e-2, rtol=5e-2)
    assert jnp.allclose(augment, ref_a, atol=5e-2, rtol=5e-2)

    print("KERNEL_OK")
</pallas_src>

<mosaic_0001>
module attributes {stable_mosaic.version = 11 : i64} {
  func.func @_memory_unit_kernel(%arg0: i32, %arg1: memref<16x32xf32, #tpu.memory_space<vmem>>, %arg2: memref<64x32xbf16, #tpu.memory_space<vmem>>, %arg3: memref<1x16xf32, #tpu.memory_space<vmem>>, %arg4: memref<16x32xf32, #tpu.memory_space<vmem>>) attributes {dimension_semantics = [#tpu.dimension_semantics<parallel>], iteration_bounds = array<i64: 1>, scalar_prefetch = 0 : i64, scratch_operands = 0 : i64, tpu.core_type = #tpu.core_type<tc>, window_params = [{transform_indices = @transform_0, window_bounds = array<i64: 16, 32>}, {pipeline_mode = #tpu.pipeline_mode<synchronous>, transform_indices = @transform_1, window_bounds = array<i64: 64, 32>}, {transform_indices = @transform_2, window_bounds = array<i64: 1, 16>}, {transform_indices = @transform_3, window_bounds = array<i64: 16, 32>}]} {
    %c0 = arith.constant 0 : index
    %c0_0 = arith.constant 0 : index
    %0 = vector.load %arg1[%c0, %c0_0] : memref<16x32xf32, #tpu.memory_space<vmem>>, vector<16x32xf32>
    %c0_1 = arith.constant 0 : index
    %c0_2 = arith.constant 0 : index
    %1 = vector.load %arg2[%c0_1, %c0_2] : memref<64x32xbf16, #tpu.memory_space<vmem>>, vector<64x32xbf16>
    %cst = arith.constant 0.176776692 : f32
    %2 = vector.broadcast %cst : f32 to vector<16x32xf32>
    %3 = arith.mulf %0, %2 : vector<16x32xf32>
    %4 = arith.truncf %3 : vector<16x32xf32> to vector<16x32xbf16>
    %cst_3 = arith.constant dense<0.000000e+00> : vector<16x64xf32>
    %5 = tpu.matmul %4, %1, %cst_3 {dimension_numbers = #tpu.dot_dimension_numbers<[1], [1], [0], [0], [0, 0, 1, 0], [], []>} : vector<16x32xbf16>, vector<64x32xbf16>, vector<16x64xf32> -> vector<16x64xf32>
    %6 = arith.negf %5 : vector<16x64xf32>
    %7 = math.exp %6 : vector<16x64xf32>
    %cst_4 = arith.constant 1.000000e+00 : f32
    %8 = vector.broadcast %cst_4 : f32 to vector<16x64xf32>
    %9 = arith.addf %8, %7 : vector<16x64xf32>
    %10 = arith.divf %8, %9 : vector<16x64xf32>
    %11 = arith.truncf %10 : vector<16x64xf32> to vector<16x64xbf16>
    %cst_5 = arith.constant dense<0.000000e+00> : vector<16x32xf32>
    %12 = tpu.matmul %11, %1, %cst_5 {dimension_numbers = #tpu.dot_dimension_numbers<[1], [0], [0], [1], [0, 0, 1, 1], [], []>} : vector<16x64xbf16>, vector<64x32xbf16>, vector<16x32xf32> -> vector<16x32xf32>
    %c0_6 = arith.constant 0 : index
    %c0_7 = arith.constant 0 : index
    %13 = vector.load %arg4[%c0_6, %c0_7] : memref<16x32xf32, #tpu.memory_space<vmem>>, vector<16x32xf32>
    tpu.vector_store %arg4[%c0_6, %c0_7], %12 {strides = array<i32>} : memref<16x32xf32, #tpu.memory_space<vmem>>, vector<16x32xf32>,
    %cst_8 = arith.constant dense<0.000000e+00> : vector<64x16xf32>
    %14 = tpu.matmul %1, %4, %cst_8 {dimension_numbers = #tpu.dot_dimension_numbers<[1], [1], [0], [0], [0, 0, 1, 0], [], []>} : vector<64x32xbf16>, vector<16x32xbf16>, vector<64x16xf32> -> vector<64x16xf32>
    %cst_9 = arith.constant 0.000000e+00 : f32
    %15 = vector.broadcast %cst_9 : f32 to vector<1x16xf32>
    %cst_10 = arith.constant dense<0xFF800000> : vector<16xf32>
    %16 = vector.multi_reduction <maximumf>, %14, %cst_10 [0] : vector<64x16xf32> to vector<16xf32>
    %17 = vector.shape_cast %16 : vector<16xf32> to vector<1x16xf32>
    %18 = arith.negf %17 : vector<1x16xf32>
    %19 = math.exp %18 : vector<1x16xf32>
    %cst_11 = arith.constant 1.000000e+00 : f32
    %20 = vector.broadcast %cst_11 : f32 to vector<1x16xf32>
    %21 = arith.addf %20, %19 : vector<1x16xf32>
    %22 = arith.divf %20, %21 : vector<1x16xf32>
    %23 = arith.addf %15, %22 : vector<1x16xf32>
    %24 = vector.broadcast %17 : vector<1x16xf32> to vector<64x16xf32>
    %25 = arith.cmpf oge, %14, %24 : vector<64x16xf32>
    %cst_12 = arith.constant 0xFF800000 : f32
    %26 = vector.broadcast %cst_12 : f32 to vector<64x16xf32>
    %27 = arith.select %25, %26, %14 : vector<64x16xi1>, vector<64x16xf32>
    %cst_13 = arith.constant dense<0xFF800000> : vector<16xf32>
    %28 = vector.multi_reduction <maximumf>, %27, %cst_13 [0] : vector<64x16xf32> to vector<16xf32>
    %29 = vector.shape_cast %28 : vector<16xf32> to vector<1x16xf32>
    %30 = arith.negf %29 : vector<1x16xf32>
    %31 = math.exp %30 : vector<1x16xf32>
    %cst_14 = arith.constant 1.000000e+00 : f32
    %32 = vector.broadcast %cst_14 : f32 to vector<1x16xf32>
    %33 = arith.addf %32, %31 : vector<1x16xf32>
    %34 = arith.divf %32, %33 : vector<1x16xf32>
    %35 = arith.addf %23, %34 : vector<1x16xf32>
    %36 = vector.broadcast %29 : vector<1x16xf32> to vector<64x16xf32>
    %37 = arith.cmpf oge, %27, %36 : vector<64x16xf32>
    %cst_15 = arith.constant 0xFF800000 : f32
    %38 = vector.broadcast %cst_15 : f32 to vector<64x16xf32>
    %39 = arith.select %37, %38, %27 : vector<64x16xi1>, vector<64x16xf32>
    %cst_16 = arith.constant dense<0xFF800000> : vector<16xf32>
    %40 = vector.multi_reduction <maximumf>, %39, %cst_16 [0] : vector<64x16xf32> to vector<16xf32>
    %41 = vector.shape_cast %40 : vector<16xf32> to vector<1x16xf32>
    %42 = arith.negf %41 : vector<1x16xf32>
    %43 = math.exp %42 : vector<1x16xf32>
    %cst_17 = arith.constant 1.000000e+00 : f32
    %44 = vector.broadcast %cst_17 : f32 to vector<1x16xf32>
    %45 = arith.addf %44, %43 : vector<1x16xf32>
    %46 = arith.divf %44, %45 : vector<1x16xf32>
    %47 = arith.addf %35, %46 : vector<1x16xf32>
    %48 = vector.broadcast %41 : vector<1x16xf32> to vector<64x16xf32>
    %49 = arith.cmpf oge, %39, %48 : vector<64x16xf32>
    %cst_18 = arith.constant 0xFF800000 : f32
    %50 = vector.broadcast %cst_18 : f32 to vector<64x16xf32>
    %51 = arith.select %49, %50, %39 : vector<64x16xi1>, vector<64x16xf32>
    %cst_19 = arith.constant dense<0xFF800000> : vector<16xf32>
    %52 = vector.multi_reduction <maximumf>, %51, %cst_19 [0] : vector<64x16xf32> to vector<16xf32>
    %53 = vector.shape_cast %52 : vector<16xf32> to vector<1x16xf32>
    %54 = arith.negf %53 : vector<1x16xf32>
    %55 = math.exp %54 : vector<1x16xf32>
    %cst_20 = arith.constant 1.000000e+00 : f32
    %56 = vector.broadcast %cst_20 : f32 to vector<1x16xf32>
    %57 = arith.addf %56, %55 : vector<1x16xf32>
    %58 = arith.divf %56, %57 : vector<1x16xf32>
    %59 = arith.addf %47, %58 : vector<1x16xf32>
    %60 = vector.broadcast %53 : vector<1x16xf32> to vector<64x16xf32>
    %61 = arith.cmpf oge, %51, %60 : vector<64x16xf32>
    %cst_21 = arith.constant 0xFF800000 : f32
    %62 = vector.broadcast %cst_21 : f32 to vector<64x16xf32>
    %63 = arith.select %61, %62, %51 : vector<64x16xi1>, vector<64x16xf32>
    %cst_22 = arith.constant dense<0xFF800000> : vector<16xf32>
    %64 = vector.multi_reduction <maximumf>, %63, %cst_22 [0] : vector<64x16xf32> to vector<16xf32>
    %65 = vector.shape_cast %64 : vector<16xf32> to vector<1x16xf32>
    %66 = arith.negf %65 : vector<1x16xf32>
    %67 = math.exp %66 : vector<1x16xf32>
    %cst_23 = arith.constant 1.000000e+00 : f32
    %68 = vector.broadcast %cst_23 : f32 to vector<1x16xf32>
    %69 = arith.addf %68, %67 : vector<1x16xf32>
    %70 = arith.divf %68, %69 : vector<1x16xf32>
    %71 = arith.addf %59, %70 : vector<1x16xf32>
    %cst_24 = arith.constant 2.000000e-01 : f32
    %72 = vector.broadcast %cst_24 : f32 to vector<1x16xf32>
    %73 = arith.mulf %71, %72 : vector<1x16xf32>
    %c0_25 = arith.constant 0 : index
    %c0_26 = arith.constant 0 : index
    %74 = vector.load %arg3[%c0_25, %c0_26] : memref<1x16xf32, #tpu.memory_space<vmem>>, vector<1x16xf32>
    tpu.vector_store %arg3[%c0_25, %c0_26], %73 {strides = array<i32>} : memref<1x16xf32, #tpu.memory_space<vmem>>, vector<1x16xf32>,
    return
  }
  func.func @transform_0(%arg0: i32) -> (i32, i32) {
    %c0_i32 = arith.constant 0 : i32
    %c0_i32_0 = arith.constant 0 : i32
    return %arg0, %c0_i32 : i32, i32
  }
  func.func @transform_1(%arg0: i32) -> (i32, i32) {
    %c0_i32 = arith.constant 0 : i32
    %c0_i32_0 = arith.constant 0 : i32
    %c0_i32_1 = arith.constant 0 : i32
    return %c0_i32, %c0_i32_0 : i32, i32
  }
  func.func @transform_2(%arg0: i32) -> (i32, i32) {
    %c0_i32 = arith.constant 0 : i32
    %c0_i32_0 = arith.constant 0 : i32
    return %c0_i32, %arg0 : i32, i32
  }
  func.func @transform_3(%arg0: i32) -> (i32, i32) {
    %c0_i32 = arith.constant 0 : i32
    %c0_i32_0 = arith.constant 0 : i32
    return %arg0, %c0_i32 : i32, i32
  }
}

</mosaic_0001>

<bundles_post_ra>
// kernel: squeeze.1
= control target key start
LH: loop header
LB: loop body
LE: loop exit
PB: predicated region body
PF: predicated region fallthrough
CT: control target
= control target key end

     0   :  { %s85_s0 = inlined_call_operand.vmem [shape: f32[16], index: 0, kind: input, shape index: {}]   ;;  %s86_s1 = inlined_call_operand.hbm [shape: f32[2,8], index: 1, kind: output, shape index: {}]  }
   0x1   :  { %v5_v0 = vld [vmem:[%s85_s0] sm:$0x1] }
   0x2   :  { %2 = vsyncpa [#allocation1], 0  ;;  %6 = vst [vmem:[#allocation3] sm:$0x1] %v5_v0  ;;  %vm8_vm0 = vcmask 64512   ;;  %s58_s0 = smov 120  }
   0x3   :  { %s59_s8 = smov [#allocation0]  }
   0x4   :  { %s26_s9 = sshll.u32 %s59_s8, 4  ;;  %s27_s9 = int_to_ptr.vmem [resolvable:$true] %s26_s9 }
   0x5   :  { %s34_s10 = scalar_lea.vmem %s27_s9, 32  ;;  %p39_p1 = scmp.lt.s32.totalorder %s27_s9, %s27_s9 }
   0x6   :  { %p35_p0 = scmp.ne.s32.totalorder %s27_s9, %s34_s10  ;;  %p40_p2 = scmp.lt.s32.totalorder %s34_s10, %s34_s10 }
   0x8   :  { %p41_p3 = por %p40_p2, %p39_p1 }
   0x9   :  { %v10_v1 = vld [vmem:[#allocation3] sm:$0x1]  }
   0xa   :  { %v7_v2 = vld [vmem:[#allocation3] sm:$0x1]   ;;  %11 = vrot.lane.b32.xlu0 %v10_v1, %s58_s0  ;;  %p42_p4 = pnand %p41_p3, %p35_p0 }
   0xb   :  { %9 = vst.msk [vmem:[#allocation2] sm:$0x1] %vm8_vm0, %v7_v2  }
  0x7c   :  { %v12_v3 = vpop.permute.xlu0 %11  }
  0x7d   :  { %15 = vst.msk [vmem:[#allocation2 + $0x1] sm:$0x1] %vm8_vm0, %v12_v3  }
  0x84   :  { %v19_v4 = vld [vmem:[#allocation2] sm:$0x3] }
  0x85   :  { %21 = vst [vmem:[#allocation0] sm:$0x3] %v19_v4 }
  0x86   :  { %45 = shalt.err (!%p42_p4)
}
  0x87   :  { %s46_s13 = scalar_lea.hbm %s86_s1, 32 }
  0x88   :  { %p47_p5 = scmp.ne.s32.totalorder %s86_s1, %s46_s13  ;;  %p50_p6 = scmp.lt.u32.totalorder %s46_s13, %s86_s1 }
  0x8a   :  { %p52_p7 = pnand %p50_p6, %p47_p5 }
  0x8c   :  { %55 = shalt.err (!%p52_p7)
}
  0x8d   :  { %29 = dma.vmem_to_hbm [thread:$0]  %s27_s9, 32, %s86_s1, [#allocation1]  }
  0x8e   :  { %56 = dma.done.wait [#allocation1], 32  }
  0x8f   :  { %57 = vsyncadd [#allocation1], 4294967264 }
  0x90   :  { %31 = vsyncpa [#allocation1], 1 }

// kernel: memory_unit_forward.1
= control target key start
LH: loop header
LB: loop body
LE: loop exit
PB: predicated region body
PF: predicated region fallthrough
CT: control target
= control target key end

     0   :  { %v590_v1 = vmov 0.0   ;;  %vm48_vm0 = vcmask 261120   ;;  %s703_s0 = inlined_call_operand.vmem [shape: f32[16,32], index: 0, kind: input, shape index: {}]   ;;  %s704_s1 = inlined_call_operand.vmem [shape: bf16[64,32], index: 1, kind: input, shape index: {}]   ;;  %s705_s2 = inlined_call_operand.vmem [shape: f32[1,16], index: 2, kind: output, shape index: {0}]   ;;  %s706_s3 = inlined_call_operand.hbm [shape: f32[16,32], index: 3, kind: output, shape index: {1}]  }
   0x1   :  { %v534_v0 = vld [vmem:[%s704_s1] sm:$0xff]   ;;  %494 = vmatprep.subr.bf16.mxu0 %v590_v1  ;;  %506 = vmatprep.subr.bf16.mxu1 %v590_v1  ;;  %v535_v3 = vld [vmem:[%s704_s1 + $0x8] sm:$0xff]  }
   0x2   :  { %v53_v2 = vsel %vm48_vm0, %v534_v0, 0  ;;  %507 = vmatpush3.bf16.msra.mxu1 %v534_v0 }
   0x3   :  { %495 = vmatpush3.bf16.xpose.msra.mxu0 %v53_v2  ;;  %508 = vmatprep.subr.bf16.mxu1 %v590_v1 }
   0x4   :  { %496 = vmatprep.subr.bf16.mxu0 %v590_v1 }
   0x5   :  { %9 = vsyncpa [#allocation3], 0  ;;  %vm591_vm1 = vmmov 0   ;;  %v15_v4 = vld [vmem:[%s703_s0] sm:$0xff]  ;;  %v16_v5 = vld [vmem:[%s703_s0 + $0x8] sm:$0xff]  ;;  %v56_v6 = vsel %vm48_vm0, %v535_v3, 0 }
   0x6   :  { %502 = vmatprep.mubr.msk.bf16.mxu0 %vm591_vm1, %v590_v1  ;;  %514 = vmatprep.mubr.msk.bf16.mxu1 %vm591_vm1, %v590_v1  ;;  %v536_v7 = vld [vmem:[%s704_s1 + $0x10] sm:$0xff]   ;;  %v25_v8 = vmul.f32 0.17677669, %v15_v4  ;;  %v26_v9 = vmul.f32 0.17677669, %v16_v5  ;;  %v537_v10 = vld [vmem:[%s704_s1 + $0x18] sm:$0xff]  }
   0x7   :  { %509 = vmatpush3.bf16.msra.mxu1 %v535_v3  ;;  %v59_v12 = vsel %vm48_vm0, %v536_v7, 0  ;;  %v62_v13 = vsel %vm48_vm0, %v537_v10, 0  ;;  %vm122_vm2 = vcmask 523264   ;;  %vm234_vm3 = vcmask 130048   ;;  %s592_s0 = smov [#allocation2]  }
   0x8   :  { %510 = vmatprep.subr.bf16.mxu1 %v590_v1  ;;  %v27_v11 = vpack.c.bf16 %v26_v9, %v25_v8  ;;  %s449_s1 = sshll.u32 %s592_s0, 4  ;;  %s450_s1 = int_to_ptr.vmem [resolvable:$true] %s449_s1 }
   0x9   :  { %s566_s24 = scalar_lea.vmem %s450_s1, 256  ;;  %p571_p1 = scmp.lt.s32.totalorder %s450_s1, %s450_s1 }
   0xa   :  { %v50_v27 = vsel %vm48_vm0, %v27_v11, 0  ;;  %p567_p0 = scmp.ne.s32.totalorder %s450_s1, %s566_s24  ;;  %p572_p2 = scmp.lt.s32.totalorder %s566_s24, %s566_s24 }
   0xb   :  { %511 = vmatpush3.bf16.msra.mxu1 %v536_v7  ;;  %497 = vmatpush3.bf16.xpose.msra.mxu0 %v56_v6 }
   0xc   :  { %512 = vmatprep.subr.bf16.mxu1 %v590_v1  ;;  %498 = vmatprep.subr.bf16.mxu0 %v590_v1  ;;  %p573_p3 = por %p572_p2, %p571_p1 }
   0xe   :  { %p574_p4 = pnand %p573_p3, %p567_p0 }
   0xf   :  { %513 = vmatpush3.bf16.msra.mxu1 %v537_v10 }
  0x10   :  { %528 = vmatprep.subr.msk.bf16.mxu1 %vm48_vm0, %v27_v11 }
  0x13   :  { %499 = vmatpush3.bf16.xpose.msra.mxu0 %v59_v12 }
  0x14   :  { %500 = vmatprep.subr.bf16.mxu0 %v590_v1 }
  0x1b   :  { %501 = vmatpush3.bf16.xpose.msra.mxu0 %v62_v13 }
  0x22   :  { %503 = vmatmul.mubr.msk.bf16.vlgmr.msra.gmra.mrb[0].mxu0 %vm48_vm0, %v27_v11 }
  0xf5   :  { %v98_v14 = vpop.f32.mrb[0].mxu0 }
  0xf6   :  { %v467_v15 = vmul.f32 -1.442695, %v98_v14  ;;  %v504_v16 = vpop.f32.mrb[1].mxu0 }
  0xf7   :  { %v101_v17 = vpop.f32.mrb[2].mxu0 }
  0xf8   :  { %538 = vpow2.f32 %v467_v15  ;;  %v468_v18 = vmul.f32 -1.442695, %v101_v17  ;;  %v505_v19 = vpop.f32.mrb[3].mxu0 }
  0xfa   :  { %540 = vpow2.f32 %v468_v18 }
 0x102   :  { %v539_v20 = vpop.eup %538 }
 0x103   :  { %v111_v21 = vadd.f32 1.0, %v539_v20 }
 0x104   :  { %v541_v22 = vpop.eup %540 }
 0x105   :  { %v112_v23 = vadd.f32 1.0, %v541_v22  ;;  %542 = vrcp.f32 %v111_v21 }
 0x107   :  { %544 = vrcp.f32 %v112_v23 }
 0x10f   :  { %v543_v24 = vpop.eup %542 }
 0x111   :  { %v545_v25 = vpop.eup %544 }
 0x112   :  { %v117_v26 = vpack.c.bf16 %v545_v25, %v543_v24 }
 0x114   :  { %515 = vmatmul.mubr.msk.bf16.vlgmr.msra.gmra.mrb[0].mxu1 %vm122_vm2, %v117_v26 }
 0x115   :  { %519 = vmatpush3.bf16.xpose.msra.mxu1 %v50_v27  ;;  %520 = vmatprep.mubr.msk.bf16.mxu1 %vm48_vm0, %v534_v0 }
 0x11c   :  { %521 = vmatmul.mubr.msk.bf16.vlgmr.msra.gmra.mrb[4].mxu1 %vm48_vm0, %v535_v3 }
 0x11d   :  { %524 = vmatprep.mubr.msk.bf16.mxu1 %vm48_vm0, %v536_v7 }
 0x124   :  { %525 = vmatmul.mubr.msk.bf16.gmra.mrb[8].mxu1 %vm48_vm0, %v537_v10 }
 0x1e7   :  { %v160_v28 = vpop.f32.mrb[0].mxu1 }
 0x1e8   :  { %167 = vst.msk [vmem:[#allocation2] sm:$0xff] %vm48_vm0, %v160_v28  ;;  %v516_v29 = vpop.f32.mrb[1].mxu1 }
 0x1e9   :  { %v163_v30 = vpop.f32.mrb[2].mxu1 }
 0x1ea   :  { %168 = vst.msk [vmem:[#allocation2 + $0x8] sm:$0xff] %vm48_vm0, %v163_v30  ;;  %v517_v31 = vpop.f32.mrb[3].mxu1 }
 0x1ef   :  { %v522_v32 = vpop.f32.mrb[4].mxu1 }
 0x1f0   :  { %v203_v33 = vpop.f32.mrb[5].mxu1  ;;  %v237_v37 = vsel %vm234_vm3, %v522_v32, -inf }
 0x1f1   :  { %v523_v34 = vpop.f32.mrb[6].mxu1  ;;  %v235_v40 = vsel %vm234_vm3, %v203_v33, -inf }
 0x1f2   :  { %v206_v35 = vpop.f32.mrb[7].mxu1  ;;  %v238_v44 = vsel %vm234_vm3, %v523_v34, -inf }
 0x1f3   :  { %v236_v48 = vsel %vm234_vm3, %v206_v35, -inf }
 0x1f7   :  { %v526_v36 = vpop.f32.mrb[8].mxu1 }
 0x1f8   :  { %v243_v38 = vsel %vm234_vm3, %v526_v36, -inf  ;;  %v219_v39 = vpop.f32.mrb[9].mxu1 }
 0x1f9   :  { %v244_v41 = vmax.f32 %v237_v37, %v243_v38  ;;  %v239_v42 = vsel %vm234_vm3, %v219_v39, -inf  ;;  %v527_v43 = vpop.f32.mrb[10].mxu1 }
 0x1fa   :  { %v240_v45 = vmax.f32 %v235_v40, %v239_v42  ;;  %v245_v46 = vsel %vm234_vm3, %v527_v43, -inf  ;;  %v222_v47 = vpop.f32.mrb[11].mxu1 }
 0x1fb   :  { %v246_v49 = vmax.f32 %v238_v44, %v245_v46  ;;  %v241_v50 = vsel %vm234_vm3, %v222_v47, -inf }
 0x1fc   :  { %v242_v51 = vmax.f32 %v236_v48, %v241_v50 }
 0x1fd   :  { %v248_v52 = vmax.f32 %v244_v41, %v246_v49 }
 0x1fe   :  { %v247_v53 = vmax.f32 %v240_v45, %v242_v51 }
 0x200   :  { %v249_v54 = vmax.f32 %v247_v53, %v248_v52 }
 0x202   :  { %v250_v55 = vrot.slane %v249_v54, 4 }
 0x204   :  { %v251_v56 = vmax.f32 %v249_v54, %v250_v55 }
 0x206   :  { %v252_v57 = vrot.slane %v251_v56, 2 }
 0x208   :  { %v253_v58 = vmax.f32 %v251_v56, %v252_v57 }
 0x20a   :  { %v254_v59 = vrot.slane %v253_v58, 1 }
 0x20c   :  { %v255_v60 = vmax.f32 %v253_v58, %v254_v59 }
 0x20e   :  { %vm263_vm4 = vcmp.ge.f32.partialorder %v203_v33, %v255_v60  ;;  %vm264_vm5 = vcmp.ge.f32.partialorder %v206_v35, %v255_v60  ;;  %vm265_vm6 = vcmp.ge.f32.partialorder %v522_v32, %v255_v60  ;;  %vm266_vm7 = vcmp.ge.f32.partialorder %v523_v34, %v255_v60 }
 0x20f   :  { %vm267_vm8 = vcmp.ge.f32.partialorder %v219_v39, %v255_v60  ;;  %vm268_vm9 = vcmp.ge.f32.partialorder %v222_v47, %v255_v60  ;;  %vm269_vm10 = vcmp.ge.f32.partialorder %v526_v36, %v255_v60  ;;  %vm270_vm11 = vcmp.ge.f32.partialorder %v527_v43, %v255_v60 }
 0x210   :  { %v271_v61 = vsel %vm263_vm4, -inf, %v203_v33  ;;  %v272_v62 = vsel %vm264_vm5, -inf, %v206_v35  ;;  %v273_v63 = vsel %vm265_vm6, -inf, %v522_v32  ;;  %v274_v0 = vsel %vm266_vm7, -inf, %v523_v34 }
 0x211   :  { %v275_v1 = vsel %vm267_vm8, -inf, %v219_v39  ;;  %v276_v2 = vsel %vm268_vm9, -inf, %v222_v47 }
 0x212   :  { %577 = shalt.err (!%p574_p4)
}
 0x213   :  { %s578_s27 = scalar_lea.hbm %s706_s3, 256 }
 0x214   :  { %p579_p5 = scmp.ne.s32.totalorder %s706_s3, %s578_s27  ;;  %p582_p6 = scmp.lt.u32.totalorder %s578_s27, %s706_s3 }
 0x216   :  { %p584_p7 = pnand %p582_p6, %p579_p5 }
 0x218   :  { %587 = shalt.err (!%p584_p7)
}
 0x219   :  { %s593_s5 = smov 128   ;;  %s594_s6 = smov 8   ;;  %v277_v3 = vsel %vm269_vm10, -inf, %v526_v36  ;;  %v278_v4 = vsel %vm270_vm11, -inf, %v527_v43  ;;  %v279_v5 = vsel %vm234_vm3, %v271_v61, -inf  ;;  %v280_v6 = vsel %vm234_vm3, %v272_v62, -inf }
 0x21a   :  { %455 = dma.vmem_to_hbm [thread:$0]  %s450_s1, 256, %s706_s3, [#allocation3], %s593_s5, %s593_s5, %s594_s6   ;;  %v281_v7 = vsel %vm234_vm3, %v273_v63, -inf  ;;  %v282_v8 = vsel %vm234_vm3, %v274_v0, -inf  ;;  %v283_v9 = vsel %vm234_vm3, %v275_v1, -inf  ;;  %v285_v10 = vsel %vm234_vm3, %v276_v2, -inf }
 0x21b   :  { %v284_v11 = vmax.f32 %v279_v5, %v283_v9  ;;  %v286_v12 = vmax.f32 %v280_v6, %v285_v10  ;;  %v287_v13 = vsel %vm234_vm3, %v277_v3, -inf  ;;  %v289_v14 = vsel %vm234_vm3, %v278_v4, -inf }
 0x21c   :  { %v288_v15 = vmax.f32 %v281_v7, %v287_v13  ;;  %v290_v16 = vmax.f32 %v282_v8, %v289_v14  ;;  %v474_v23 = vmul.f32 -1.442695, %v255_v60 }
 0x21d   :  { %v291_v17 = vmax.f32 %v284_v11, %v286_v12 }
 0x21e   :  { %v292_v18 = vmax.f32 %v288_v15, %v290_v16  ;;  %546 = vpow2.f32 %v474_v23 }
 0x220   :  { %v293_v19 = vmax.f32 %v291_v17, %v292_v18 }
 0x222   :  { %v294_v20 = vrot.slane %v293_v19, 4 }
 0x224   :  { %v295_v21 = vmax.f32 %v293_v19, %v294_v20 }
 0x226   :  { %v296_v22 = vrot.slane %v295_v21, 2 }
 0x228   :  { %v297_v24 = vmax.f32 %v295_v21, %v296_v22  ;;  %v547_v46 = vpop.eup %546 }
 0x229   :  { %v259_v51 = vadd.f32 1.0, %v547_v46 }
 0x22a   :  { %v298_v25 = vrot.slane %v297_v24, 1 }
 0x22c   :  { %v299_v26 = vmax.f32 %v297_v24, %v298_v25 }
 0x22e   :  { %v475_v27 = vmul.f32 -1.442695, %v299_v26  ;;  %vm307_vm12 = vcmp.ge.f32.partialorder %v271_v61, %v299_v26  ;;  %vm308_vm13 = vcmp.ge.f32.partialorder %v272_v62, %v299_v26  ;;  %vm309_vm14 = vcmp.ge.f32.partialorder %v273_v63, %v299_v26 }
 0x22f   :  { %vm310_vm15 = vcmp.ge.f32.partialorder %v274_v0, %v299_v26  ;;  %vm311_vm0 = vcmp.ge.f32.partialorder %v275_v1, %v299_v26  ;;  %vm312_vm1 = vcmp.ge.f32.partialorder %v276_v2, %v299_v26  ;;  %vm313_vm2 = vcmp.ge.f32.partialorder %v277_v3, %v299_v26 }
 0x230   :  { %548 = vpow2.f32 %v475_v27  ;;  %vm314_vm4 = vcmp.ge.f32.partialorder %v278_v4, %v299_v26  ;;  %v315_v28 = vsel %vm307_vm12, -inf, %v271_v61  ;;  %v316_v29 = vsel %vm308_vm13, -inf, %v272_v62 }
 0x231   :  { %v317_v30 = vsel %vm309_vm14, -inf, %v273_v63  ;;  %v318_v31 = vsel %vm310_vm15, -inf, %v274_v0  ;;  %v319_v32 = vsel %vm311_vm0, -inf, %v275_v1  ;;  %v320_v33 = vsel %vm312_vm1, -inf, %v276_v2 }
 0x232   :  { %v321_v34 = vsel %vm313_vm2, -inf, %v277_v3  ;;  %v322_v35 = vsel %vm314_vm4, -inf, %v278_v4  ;;  %v323_v36 = vsel %vm234_vm3, %v315_v28, -inf  ;;  %v324_v37 = vsel %vm234_vm3, %v316_v29, -inf }
 0x233   :  { %v325_v38 = vsel %vm234_vm3, %v317_v30, -inf  ;;  %v326_v39 = vsel %vm234_vm3, %v318_v31, -inf  ;;  %v327_v40 = vsel %vm234_vm3, %v319_v32, -inf  ;;  %v329_v41 = vsel %vm234_vm3, %v320_v33, -inf }
 0x234   :  { %v328_v42 = vmax.f32 %v323_v36, %v327_v40  ;;  %v330_v43 = vmax.f32 %v324_v37, %v329_v41  ;;  %v331_v44 = vsel %vm234_vm3, %v321_v34, -inf  ;;  %v333_v45 = vsel %vm234_vm3, %v322_v35, -inf }
 0x235   :  { %v332_v47 = vmax.f32 %v325_v38, %v331_v44  ;;  %v334_v48 = vmax.f32 %v326_v39, %v333_v45  ;;  %550 = vrcp.f32 %v259_v51 }
 0x236   :  { %v335_v49 = vmax.f32 %v328_v42, %v330_v43 }
 0x237   :  { %v336_v50 = vmax.f32 %v332_v47, %v334_v48 }
 0x239   :  { %v337_v52 = vmax.f32 %v335_v49, %v336_v50 }
 0x23a   :  { %v549_v53 = vpop.eup %548 }
 0x23b   :  { %v303_v54 = vadd.f32 1.0, %v549_v53  ;;  %v338_v55 = vrot.slane %v337_v52, 4 }
 0x23d   :  { %552 = vrcp.f32 %v303_v54  ;;  %v339_v56 = vmax.f32 %v337_v52, %v338_v55 }
 0x23f   :  { %v340_v57 = vrot.slane %v339_v56, 2  ;;  %v551_v61 = vpop.eup %550 }
 0x241   :  { %v341_v58 = vmax.f32 %v339_v56, %v340_v57 }
 0x243   :  { %v342_v59 = vrot.slane %v341_v58, 1 }
 0x245   :  { %v343_v60 = vmax.f32 %v341_v58, %v342_v59 }
 0x247   :  { %v553_v62 = vpop.eup %552  ;;  %v476_v63 = vmul.f32 -1.442695, %v343_v60  ;;  %vm351_vm5 = vcmp.ge.f32.partialorder %v315_v28, %v343_v60  ;;  %vm352_vm6 = vcmp.ge.f32.partialorder %v316_v29, %v343_v60  ;;  %vm353_vm7 = vcmp.ge.f32.partialorder %v317_v30, %v343_v60 }
 0x248   :  { %v306_v0 = vadd.f32 %v553_v62, %v551_v61  ;;  %vm354_vm8 = vcmp.ge.f32.partialorder %v318_v31, %v343_v60  ;;  %vm355_vm9 = vcmp.ge.f32.partialorder %v319_v32, %v343_v60  ;;  %vm356_vm10 = vcmp.ge.f32.partialorder %v320_v33, %v343_v60 }
 0x249   :  { %554 = vpow2.f32 %v476_v63  ;;  %vm357_vm11 = vcmp.ge.f32.partialorder %v321_v34, %v343_v60  ;;  %vm358_vm12 = vcmp.ge.f32.partialorder %v322_v35, %v343_v60  ;;  %v359_v1 = vsel %vm351_vm5, -inf, %v315_v28 }
 0x24a   :  { %v360_v2 = vsel %vm352_vm6, -inf, %v316_v29  ;;  %v361_v3 = vsel %vm353_vm7, -inf, %v317_v30  ;;  %v362_v4 = vsel %vm354_vm8, -inf, %v318_v31  ;;  %v363_v5 = vsel %vm355_vm9, -inf, %v319_v32 }
 0x24b   :  { %v364_v6 = vsel %vm356_vm10, -inf, %v320_v33  ;;  %v365_v7 = vsel %vm357_vm11, -inf, %v321_v34  ;;  %v366_v8 = vsel %vm358_vm12, -inf, %v322_v35  ;;  %v367_v9 = vsel %vm234_vm3, %v359_v1, -inf }
 0x24c   :  { %v368_v10 = vsel %vm234_vm3, %v360_v2, -inf  ;;  %v369_v11 = vsel %vm234_vm3, %v361_v3, -inf  ;;  %v370_v12 = vsel %vm234_vm3, %v362_v4, -inf  ;;  %v371_v13 = vsel %vm234_vm3, %v363_v5, -inf }
 0x24d   :  { %v372_v14 = vmax.f32 %v367_v9, %v371_v13  ;;  %v373_v15 = vsel %vm234_vm3, %v364_v6, -inf  ;;  %v375_v16 = vsel %vm234_vm3, %v365_v7, -inf  ;;  %v377_v17 = vsel %vm234_vm3, %v366_v8, -inf }
 0x24e   :  { %v374_v18 = vmax.f32 %v368_v10, %v373_v15  ;;  %v376_v19 = vmax.f32 %v369_v11, %v375_v16  ;;  %v378_v20 = vmax.f32 %v370_v12, %v377_v17 }
 0x250   :  { %v379_v21 = vmax.f32 %v372_v14, %v374_v18  ;;  %v380_v22 = vmax.f32 %v376_v19, %v378_v20 }
 0x252   :  { %v381_v23 = vmax.f32 %v379_v21, %v380_v22 }
 0x253   :  { %v555_v24 = vpop.eup %554 }
 0x254   :  { %v347_v25 = vadd.f32 1.0, %v555_v24  ;;  %v382_v26 = vrot.slane %v381_v23, 4 }
 0x256   :  { %556 = vrcp.f32 %v347_v25  ;;  %v383_v27 = vmax.f32 %v381_v23, %v382_v26 }
 0x258   :  { %v384_v28 = vrot.slane %v383_v27, 2 }
 0x25a   :  { %v385_v29 = vmax.f32 %v383_v27, %v384_v28 }
 0x25c   :  { %v386_v30 = vrot.slane %v385_v29, 1 }
 0x25e   :  { %v387_v31 = vmax.f32 %v385_v29, %v386_v30 }
 0x260   :  { %v557_v32 = vpop.eup %556  ;;  %v477_v33 = vmul.f32 -1.442695, %v387_v31  ;;  %vm395_vm13 = vcmp.ge.f32.partialorder %v359_v1, %v387_v31  ;;  %vm396_vm14 = vcmp.ge.f32.partialorder %v360_v2, %v387_v31  ;;  %vm397_vm15 = vcmp.ge.f32.partialorder %v361_v3, %v387_v31 }
 0x261   :  { %v350_v34 = vadd.f32 %v557_v32, %v306_v0  ;;  %vm398_vm0 = vcmp.ge.f32.partialorder %v362_v4, %v387_v31  ;;  %vm399_vm1 = vcmp.ge.f32.partialorder %v363_v5, %v387_v31  ;;  %vm400_vm2 = vcmp.ge.f32.partialorder %v364_v6, %v387_v31 }
 0x262   :  { %558 = vpow2.f32 %v477_v33  ;;  %vm401_vm4 = vcmp.ge.f32.partialorder %v365_v7, %v387_v31  ;;  %vm402_vm5 = vcmp.ge.f32.partialorder %v366_v8, %v387_v31  ;;  %v403_v35 = vsel %vm395_vm13, -inf, %v359_v1 }
 0x263   :  { %v404_v36 = vsel %vm396_vm14, -inf, %v360_v2  ;;  %v405_v37 = vsel %vm397_vm15, -inf, %v361_v3  ;;  %v406_v38 = vsel %vm398_vm0, -inf, %v362_v4  ;;  %v407_v39 = vsel %vm399_vm1, -inf, %v363_v5 }
 0x264   :  { %v408_v40 = vsel %vm400_vm2, -inf, %v364_v6  ;;  %v409_v41 = vsel %vm401_vm4, -inf, %v365_v7  ;;  %v410_v42 = vsel %vm402_vm5, -inf, %v366_v8  ;;  %v411_v43 = vsel %vm234_vm3, %v403_v35, -inf }
 0x265   :  { %v412_v44 = vsel %vm234_vm3, %v404_v36, -inf  ;;  %v413_v45 = vsel %vm234_vm3, %v405_v37, -inf  ;;  %v414_v46 = vsel %vm234_vm3, %v406_v38, -inf  ;;  %v415_v47 = vsel %vm234_vm3, %v407_v39, -inf }
 0x266   :  { %v416_v48 = vmax.f32 %v411_v43, %v415_v47  ;;  %v417_v49 = vsel %vm234_vm3, %v408_v40, -inf  ;;  %v419_v50 = vsel %vm234_vm3, %v409_v41, -inf  ;;  %v421_v51 = vsel %vm234_vm3, %v410_v42, -inf }
 0x267   :  { %v418_v52 = vmax.f32 %v412_v44, %v417_v49  ;;  %v420_v53 = vmax.f32 %v413_v45, %v419_v50  ;;  %v422_v54 = vmax.f32 %v414_v46, %v421_v51  ;;  %vm440_vm3 = vcmask 122880  }
 0x269   :  { %v423_v55 = vmax.f32 %v416_v48, %v418_v52  ;;  %v424_v56 = vmax.f32 %v420_v53, %v422_v54 }
 0x26b   :  { %v425_v57 = vmax.f32 %v423_v55, %v424_v56 }
 0x26c   :  { %v559_v58 = vpop.eup %558 }
 0x26d   :  { %v391_v59 = vadd.f32 1.0, %v559_v58  ;;  %v426_v60 = vrot.slane %v425_v57, 4 }
 0x26f   :  { %560 = vrcp.f32 %v391_v59  ;;  %v427_v61 = vmax.f32 %v425_v57, %v426_v60 }
 0x271   :  { %v428_v62 = vrot.slane %v427_v61, 2 }
 0x273   :  { %v429_v63 = vmax.f32 %v427_v61, %v428_v62 }
 0x275   :  { %v430_v0 = vrot.slane %v429_v63, 1 }
 0x277   :  { %v431_v1 = vmax.f32 %v429_v63, %v430_v0 }
 0x279   :  { %v561_v2 = vpop.eup %560  ;;  %v478_v3 = vmul.f32 -1.442695, %v431_v1 }
 0x27a   :  { %v394_v4 = vadd.f32 %v561_v2, %v350_v34 }
 0x27b   :  { %562 = vpow2.f32 %v478_v3 }
 0x285   :  { %v563_v5 = vpop.eup %562 }
 0x286   :  { %v435_v6 = vadd.f32 1.0, %v563_v5 }
 0x288   :  { %564 = vrcp.f32 %v435_v6 }
 0x292   :  { %v565_v7 = vpop.eup %564 }
 0x293   :  { %v438_v8 = vadd.f32 %v565_v7, %v394_v4 }
 0x295   :  { %v439_v9 = vmul.f32 0.2, %v438_v8 }
 0x297   :  { %441 = vst.msk [vmem:[%s705_s2] sm:$0x1] %vm440_vm3, %v439_v9 }
 0x298   :  { %588 = dma.done.wait [#allocation3], 256  }
 0x299   :  { %589 = vsyncadd [#allocation3], 4294967040 }
 0x29a   :  { %461 = vsyncpa [#allocation3], 1 }

</bundles_post_ra>
